<compile_context>
chip_gen: v6e
topology: v6e:2x2x1
jax: 0.10.0
libtpu: 0.0.40
codegen_flags: <defaults>
</compile_context>

<pallas_src>
import jax
import jax.numpy as jnp
from jax.experimental import pallas as pl
from jax.experimental.pallas import tpu as pltpu

_LANE = 128
_SUBLANE_ALIGN = 32                    # multiple of 32 rows is packing-safe for
                                       # f32 (8), bf16 (16), int8/fp8 (32)
_TARGET_TILE_BYTES = 8 * 1024 * 1024   # ~8 MiB tiles amortize ~0.35 us/step
_VMEM_LIMIT_BYTES = 40 << 20           # headroom under v7x's 64 MiB physical VMEM


def _passthrough_kernel(x_ref, o_ref):
    # Output is aliased to the input buffer; there is nothing to move.
    # `touch` pins the aliased output so the call has a visible effect; no DMA.
    del x_ref
    pltpu.touch(o_ref)


def _copy_kernel(x_ref, o_ref):
    # Plain VMEM tile copy (materializing fallback only).
    o_ref[...] = x_ref[...]


def _identity_no_dma(x: jax.Array) -> jax.Array:
    """Aliased, ANY-memory-space pass-through: no HBM traffic at all."""
    return pl.pallas_call(
        _passthrough_kernel,
        out_shape=jax.ShapeDtypeStruct(x.shape, x.dtype),
        in_specs=[pl.BlockSpec(memory_space=pl.ANY)],
        out_specs=pl.BlockSpec(memory_space=pl.ANY),
        input_output_aliases={0: 0},
        compiler_params=pltpu.CompilerParams(has_side_effects=True),
        cost_estimate=pl.CostEstimate(flops=0, transcendentals=0,
                                      bytes_accessed=0),
    )(x)


def _identity_copy(x: jax.Array) -> jax.Array:
    """Fallback: HBM-bandwidth-bound tiled copy, still aliased in->out."""
    orig_shape = x.shape
    total = x.size
    itemsize = jnp.dtype(x.dtype).itemsize

    if total % _LANE == 0:
        # Lane-dense 2-D view: full-lane, unmasked stores, contiguous DMA.
        rows, cols = total // _LANE, _LANE
    else:
        # Keep the (full-extent) trailing dim so the block shape stays legal,
        # and tile over the leading rows instead of one giant untiled block.
        cols = orig_shape[-1] if x.ndim >= 1 and orig_shape[-1] > 0 else total
        rows = total // cols
        if rows == 0:
            rows, cols = 1, total

    flat = x.reshape(rows, cols)

    block_rows = max(1, _TARGET_TILE_BYTES // max(1, cols * itemsize))
    if block_rows >= rows:
        block_rows = rows                                   # full extent: legal
    else:
        block_rows = max(_SUBLANE_ALIGN,
                         (block_rows // _SUBLANE_ALIGN) * _SUBLANE_ALIGN)
        if block_rows >= rows:
            block_rows = rows

    grid = (pl.cdiv(rows, block_rows),)
    bytes_accessed = 2 * total * itemsize

    flat_out = pl.pallas_call(
        _copy_kernel,
        out_shape=jax.ShapeDtypeStruct((rows, cols), x.dtype),
        grid=grid,
        in_specs=[pl.BlockSpec((block_rows, cols), lambda i: (i, 0))],
        out_specs=pl.BlockSpec((block_rows, cols), lambda i: (i, 0)),
        input_output_aliases={0: 0},
        compiler_params=pltpu.CompilerParams(
            dimension_semantics=("parallel",),
            vmem_limit_bytes=_VMEM_LIMIT_BYTES,
        ),
        cost_estimate=pl.CostEstimate(flops=0, transcendentals=0,
                                      bytes_accessed=bytes_accessed),
    )(flat)
    return flat_out.reshape(orig_shape)


def identity_head(x: jax.Array) -> jax.Array:
    """Pallas implementation of IdentityHead.forward (returns x unchanged)."""
    if x.size == 0:
        return x
    try:
        return _identity_no_dma(x)
    except Exception:
        # Robustness only: if the zero-DMA pass-through cannot lower on some
        # backend/configuration, fall back to the tiled streaming copy.
        return _identity_copy(x)


if __name__ == "__main__":
    key = jax.random.PRNGKey(0)
    # Small timeseries-shaped input: batch=2, seq=8, hidden=32.
    x = jax.random.normal(key, (2, 8, 32), dtype=jnp.float32)

    y = identity_head(x)
    jax.block_until_ready(y)

    # Compare against regenerated values so the check never reads a
    # possibly-aliased/donated input buffer.
    expected = jax.random.normal(jax.random.PRNGKey(0), (2, 8, 32),
                                 dtype=jnp.float32)
    assert y.shape == expected.shape and y.dtype == expected.dtype
    assert bool(jnp.array_equal(y, expected))

    # Also exercise a non-128-divisible shape (same zero-DMA code path).
    x2 = jax.random.normal(jax.random.PRNGKey(1), (3, 5, 7), dtype=jnp.float32)
    y2 = identity_head(x2)
    jax.block_until_ready(y2)
    expected2 = jax.random.normal(jax.random.PRNGKey(1), (3, 5, 7),
                                  dtype=jnp.float32)
    assert bool(jnp.array_equal(y2, expected2))

    print("KERNEL_OK")
</pallas_src>

<mosaic_0001>
module attributes {stable_mosaic.version = 11 : i64} {
  func.func @_passthrough_kernel(%arg0: memref<2x8x32xf32, #tpu.memory_space<any>>, %arg1: memref<2x8x32xf32, #tpu.memory_space<any>>) attributes {dimension_semantics = [], scalar_prefetch = 0 : i64, scratch_operands = 0 : i64, tpu.core_type = #tpu.core_type<tc>} {
    return
  }
}

module attributes {stable_mosaic.version = 11 : i64} {
  func.func @_copy_kernel(%arg0: i32, %arg1: memref<4x128xf32, #tpu.memory_space<vmem>>, %arg2: memref<4x128xf32, #tpu.memory_space<vmem>>) attributes {dimension_semantics = [#tpu.dimension_semantics<parallel>], iteration_bounds = array<i64: 1>, scalar_prefetch = 0 : i64, scratch_operands = 0 : i64, tpu.core_type = #tpu.core_type<tc>, window_params = [{transform_indices = @transform_0, window_bounds = array<i64: 4, 128>}, {transform_indices = @transform_1, window_bounds = array<i64: 4, 128>}]} {
    %c0 = arith.constant 0 : index
    %c0_0 = arith.constant 0 : index
    %0 = vector.load %arg1[%c0, %c0_0] : memref<4x128xf32, #tpu.memory_space<vmem>>, vector<4x128xf32>
    %c0_1 = arith.constant 0 : index
    %c0_2 = arith.constant 0 : index
    %1 = vector.load %arg2[%c0_1, %c0_2] : memref<4x128xf32, #tpu.memory_space<vmem>>, vector<4x128xf32>
    tpu.vector_store %arg2[%c0_1, %c0_2], %0 {strides = array<i32>} : memref<4x128xf32, #tpu.memory_space<vmem>>, vector<4x128xf32>,
    return
  }
  func.func @transform_0(%arg0: i32) -> (i32, i32) {
    %c0_i32 = arith.constant 0 : i32
    %c0_i32_0 = arith.constant 0 : i32
    return %arg0, %c0_i32 : i32, i32
  }
  func.func @transform_1(%arg0: i32) -> (i32, i32) {
    %c0_i32 = arith.constant 0 : i32
    %c0_i32_0 = arith.constant 0 : i32
    return %arg0, %c0_i32 : i32, i32
  }
}

</mosaic_0001>

<bundles_post_ra>
// kernel: tpu_custom_call.1
= control target key start
LH: loop header
LB: loop body
LE: loop exit
PB: predicated region body
PF: predicated region fallthrough
CT: control target
= control target key end

     0   :  { %s16_s0 = inlined_call_operand.hbm [shape: f32[2,8,32], index: 0, kind: input, shape index: {}, may-alias: {0,1}]   ;;  %s17_s1 = inlined_call_operand.hbm [shape: f32[2,8,32], index: 1, kind: output, shape index: {}, may-alias: {0,1}]  }

// kernel: tpu_custom_call.1
= control target key start
LH: loop header
LB: loop body
LE: loop exit
PB: predicated region body
PF: predicated region fallthrough
CT: control target
= control target key end

     0   :  { %6 = vsyncpa [#allocation3], 0  ;;  %s102_s0 = inlined_call_operand.hbm [shape: f32[4,128], index: 0, kind: input, shape index: {}, may-alias: {0,1}]   ;;  %s103_s1 = inlined_call_operand.hbm [shape: f32[4,128], index: 1, kind: output, shape index: {}, may-alias: {0,1}]  }
   0x1   :  { %7 = vsyncpa [#allocation4], 0  ;;  %s84_s6 = smov [#allocation2]  }
   0x2   :  { %s14_s7 = sshll.u32 %s84_s6, 4  ;;  %s15_s7 = int_to_ptr.vmem [resolvable:$true] %s14_s7 }
   0x3   :  { %s48_s8 = scalar_lea.vmem %s15_s7, 64  ;;  %p53_p1 = scmp.lt.s32.totalorder %s15_s7, %s15_s7 }
   0x4   :  { %p49_p0 = scmp.ne.s32.totalorder %s15_s7, %s48_s8  ;;  %p54_p2 = scmp.lt.s32.totalorder %s48_s8, %s48_s8 }
   0x6   :  { %p55_p3 = por %p54_p2, %p53_p1 }
   0x8   :  { %p56_p4 = pnand %p55_p3, %p49_p0 }
   0xa   :  { %59 = shalt.err (!%p56_p4)
}
   0xb   :  { %17 = dma.hbm_to_vmem [thread:$0]  %s102_s0, 64, %s15_s7, [#allocation3]  }
   0xc   :  { %80 = dma.done.wait [#allocation3], 64  }
   0xd   :  { %81 = vsyncadd [#allocation3], 4294967232  ;;  %s85_s11 = smov [#allocation5]   ;;  %v21_v0 = vld [vmem:[#allocation2] sm:$0xf] }
   0xe   :  { %s29_s12 = sshll.u32 %s85_s11, 4  ;;  %22 = vst [vmem:[#allocation5] sm:$0xf] %v21_v0  ;;  %s30_s12 = int_to_ptr.vmem [resolvable:$true] %s29_s12 }
   0xf   :  { %s60_s13 = scalar_lea.vmem %s30_s12, 64  ;;  %p65_p6 = scmp.lt.s32.totalorder %s30_s12, %s30_s12 }
  0x10   :  { %p61_p5 = scmp.ne.s32.totalorder %s30_s12, %s60_s13  ;;  %p66_p7 = scmp.lt.s32.totalorder %s60_s13, %s60_s13 }
  0x12   :  { %p67_p8 = por %p66_p7, %p65_p6 }
  0x14   :  { %p68_p9 = pnand %p67_p8, %p61_p5 }
  0x16   :  { %71 = shalt.err (!%p68_p9)
}
  0x17   :  { %32 = dma.vmem_to_hbm [thread:$0]  %s30_s12, 64, %s103_s1, [#allocation4]  }
  0x18   :  { %82 = dma.done.wait [#allocation4], 64  }
  0x19   :  { %83 = vsyncadd [#allocation4], 4294967232 }
  0x1a   :  { %36 = vsyncpa [#allocation3], 1 }
  0x1b   :  { %37 = vsyncpa [#allocation4], 1 }

</bundles_post_ra>
